<compile_context>
chip_gen: v7x
topology: tpu7x:2x2x1
jax: 0.10.0
libtpu: 0.0.40
codegen_flags: <defaults>
</compile_context>

<pallas_src>
import functools

import jax
import jax.numpy as jnp
from jax.experimental import pallas as pl
from jax.experimental.pallas import tpu as pltpu


# ----------------------------- Pallas kernel --------------------------------


def _grouped_mlp_kernel(block_expert_ref, x_ref, w_ref, wg_ref, wu_ref, wd_ref,
                        y_ref):
    """One grid step = (token block b, intermediate tile i).

    All rows of a token block belong to a single expert (tokens were sorted by
    expert and per-expert padded to a multiple of the block size in the
    wrapper).  `block_expert_ref` (scalar-prefetched, SMEM) holds that expert
    id and is consumed by the weight index_maps, so each expert only processes
    its own tokens.

      y[b] += ( silu(x @ wg[e][:, iT]) * (x @ wu[e][:, iT]) * w ) @ wd[e][iT, :]
    """
    i = pl.program_id(1)

    @pl.when(i == 0)
    def _():
        y_ref[...] = jnp.zeros_like(y_ref)

    x = x_ref[...]                                                    # (TM, H) bf16
    gate = jnp.dot(x, wg_ref[0], preferred_element_type=jnp.float32)  # (TM, TI) f32
    up = jnp.dot(x, wu_ref[0], preferred_element_type=jnp.float32)    # (TM, TI) f32
    act = gate * jax.nn.sigmoid(gate) * up                            # silu(gate)*up
    act = act * w_ref[...]                                            # fold combine weight
    y_ref[...] += jnp.dot(act.astype(wd_ref.dtype), wd_ref[0],
                          preferred_element_type=jnp.float32)         # (TM, H) f32


# ------------------------------ Python wrapper -------------------------------


@functools.partial(jax.jit,
                   static_argnames=("top_k", "block_tokens", "block_inter"))
def moe_forward(hidden_states, wr, wg, wu, wd, *, top_k,
                block_tokens=256, block_inter=None):
    """Returns (output, router_logits) — matches MoE.forward with
    return_router_logits=True, return_bias=False, is_test=False."""
    B, S, H = hidden_states.shape
    T = B * S
    E, _, I = wg.shape
    TM = block_tokens
    TI = I if block_inter is None else block_inter
    assert I % TI == 0

    compute_dtype = jnp.bfloat16            # MXU-native; accumulation stays f32

    x = hidden_states.reshape(T, H)

    # ---- Router: tiny (T,H)@(H,E) matmul + softmax/top-k, done by XLA -------
    x32 = x.astype(jnp.float32)
    router_logits = jnp.dot(x32, wr.astype(jnp.float32),
                            precision=jax.lax.Precision.HIGHEST)      # (T, E)
    affinities = jax.nn.softmax(router_logits, axis=-1)
    topk_vals, expert_index = jax.lax.top_k(affinities, top_k)        # (T, k)
    topk_vals = topk_vals / jnp.maximum(
        jnp.sum(topk_vals, axis=-1, keepdims=True), 1e-9)             # normalize

    # ---- Dispatch: sort assignments by expert; pad each expert's group to a
    #      multiple of TM so every token block is owned by exactly one expert.
    N = T * top_k
    token_flat = jnp.repeat(jnp.arange(T, dtype=jnp.int32), top_k)    # (N,)
    expert_flat = expert_index.reshape(N).astype(jnp.int32)           # (N,)
    weight_flat = topk_vals.reshape(N).astype(jnp.float32)            # (N,)

    order = jnp.argsort(expert_flat)
    s_expert = expert_flat[order]
    s_token = token_flat[order]
    s_weight = weight_flat[order]

    counts = jnp.sum(
        (expert_flat[:, None] == jnp.arange(E, dtype=jnp.int32)[None, :]
         ).astype(jnp.int32), axis=0)                                 # (E,)
    raw_off = jnp.concatenate(
        [jnp.zeros((1,), jnp.int32), jnp.cumsum(counts)[:-1]])
    padded_counts = ((counts + TM - 1) // TM) * TM
    padded_off = jnp.concatenate(
        [jnp.zeros((1,), jnp.int32), jnp.cumsum(padded_counts)[:-1]])

    pos_in_group = jnp.arange(N, dtype=jnp.int32) - raw_off[s_expert]
    dest = padded_off[s_expert] + pos_in_group                        # unique

    num_blocks = -(-N // TM) + E            # static upper bound on blocks
    N_pad = num_blocks * TM

    x_pad = jnp.zeros((N_pad, H), compute_dtype).at[dest].set(
        x[s_token].astype(compute_dtype))
    w_pad = jnp.zeros((N_pad, 1), jnp.float32).at[dest].set(s_weight[:, None])
    tok_pad = jnp.zeros((N_pad,), jnp.int32).at[dest].set(s_token)

    cum_padded = jnp.cumsum(padded_counts)                            # inclusive
    block_starts = jnp.arange(num_blocks, dtype=jnp.int32) * TM
    block_expert = jnp.clip(
        jnp.searchsorted(cum_padded, block_starts, side="right"),
        0, E - 1).astype(jnp.int32)                                   # (num_blocks,)

    wg_c = wg.astype(compute_dtype)
    wu_c = wu.astype(compute_dtype)
    wd_c = wd.astype(compute_dtype)

    # ---- Grouped expert MLP (Pallas) ----------------------------------------
    y_pad = pl.pallas_call(
        _grouped_mlp_kernel,
        out_shape=jax.ShapeDtypeStruct((N_pad, H), jnp.float32),
        grid_spec=pltpu.PrefetchScalarGridSpec(
            num_scalar_prefetch=1,
            grid=(num_blocks, I // TI),
            in_specs=[
                pl.BlockSpec((TM, H), lambda b, i, be: (b, 0)),          # tokens
                pl.BlockSpec((TM, 1), lambda b, i, be: (b, 0)),          # weights
                pl.BlockSpec((1, H, TI), lambda b, i, be: (be[b], 0, i)),  # gate
                pl.BlockSpec((1, H, TI), lambda b, i, be: (be[b], 0, i)),  # up
                pl.BlockSpec((1, TI, H), lambda b, i, be: (be[b], i, 0)),  # down
            ],
            out_specs=pl.BlockSpec((TM, H), lambda b, i, be: (b, 0)),
        ),
        compiler_params=pltpu.CompilerParams(
            dimension_semantics=("parallel", "arbitrary"),
            vmem_limit_bytes=64 * 1024 * 1024,
        ),
    )(block_expert, x_pad, w_pad, wg_c, wu_c, wd_c)

    # ---- Combine: scatter-add (already affinity-weighted) outputs to tokens.
    #      Padding rows have x == 0 and weight == 0, so they contribute 0.
    out_flat = jnp.zeros((T, H), jnp.float32).at[tok_pad].add(y_pad)
    output = out_flat.reshape(B, S, H).astype(hidden_states.dtype)
    return output, router_logits


# ------------------------------ JAX reference --------------------------------


def moe_reference(hidden_states, wr, wg, wu, wd, *, top_k):
    """Pure-JAX (fp32) reference for correctness checking."""
    B, S, H = hidden_states.shape
    x = hidden_states.reshape(-1, H).astype(jnp.float32)
    logits = jnp.dot(x, wr.astype(jnp.float32),
                     precision=jax.lax.Precision.HIGHEST)
    aff = jax.nn.softmax(logits, axis=-1)
    vals, idx = jax.lax.top_k(aff, top_k)
    vals = vals / jnp.sum(vals, axis=-1, keepdims=True)
    T, E = logits.shape
    comb = jnp.zeros((T, E), jnp.float32).at[jnp.arange(T)[:, None], idx].set(vals)
    gate = jnp.einsum("th,ehi->tei", x, wg)
    up = jnp.einsum("th,ehi->tei", x, wu)
    act = jax.nn.silu(gate) * up                         # (T, E, I)
    per_expert = jnp.einsum("tei,eih->teh", act, wd)     # (T, E, H)
    out = jnp.einsum("te,teh->th", comb, per_expert)
    return out.reshape(B, S, H), logits


# ----------------------------------- main ------------------------------------

if __name__ == "__main__":
    B, S, H, I, E, TOP_K = 2, 8, 32, 64, 4, 2
    TM = 32      # token block (use 256-512 at production sizes)
    TI = 64      # intermediate tile (= I here; use 512+ multiples of 128 at prod)

    key = jax.random.PRNGKey(0)
    k_x, k_r, k_g, k_u, k_d = jax.random.split(key, 5)

    hidden_states = jax.random.normal(k_x, (B, S, H), dtype=jnp.float32)

    # Deterministic "kaiming-uniform-like" init (bound = 1/sqrt(fan_in)).
    def uinit(k, shape, fan_in):
        bound = 1.0 / jnp.sqrt(fan_in)
        return jax.random.uniform(k, shape, jnp.float32, -bound, bound)

    wr = uinit(k_r, (H, E), H)        # router:  x @ wr -> (T, E)
    wg = uinit(k_g, (E, H, I), H)     # gate_proj per expert
    wu = uinit(k_u, (E, H, I), H)     # up_proj per expert
    wd = uinit(k_d, (E, I, H), I)     # down_proj per expert

    out, router_logits = moe_forward(hidden_states, wr, wg, wu, wd,
                                     top_k=TOP_K, block_tokens=TM,
                                     block_inter=TI)
    jax.block_until_ready(out)
    jax.block_until_ready(router_logits)

    ref_out, ref_logits = moe_reference(hidden_states, wr, wg, wu, wd,
                                        top_k=TOP_K)
    assert out.shape == hidden_states.shape
    assert router_logits.shape == (B * S, E)
    assert jnp.allclose(router_logits, ref_logits, atol=1e-4, rtol=1e-4)
    # Expert MLPs run in bf16 on the MXU (f32 accumulation) -> loose tolerance.
    assert jnp.allclose(out, ref_out, atol=5e-2, rtol=5e-2)

    print("KERNEL_OK")
</pallas_src>

<mosaic_0001>
module attributes {stable_mosaic.version = 11 : i64} {
  func.func @_grouped_mlp_kernel(%arg0: i32, %arg1: i32, %arg2: memref<5xi32, #tpu.memory_space<smem>>, %arg3: memref<32x32xbf16, #tpu.memory_space<vmem>>, %arg4: memref<32x1xf32, #tpu.memory_space<vmem>>, %arg5: memref<1x32x64xbf16, #tpu.memory_space<vmem>>, %arg6: memref<1x32x64xbf16, #tpu.memory_space<vmem>>, %arg7: memref<1x64x32xbf16, #tpu.memory_space<vmem>>, %arg8: memref<32x32xf32, #tpu.memory_space<vmem>>) attributes {dimension_semantics = [#tpu.dimension_semantics<parallel>, #tpu.dimension_semantics<arbitrary>], iteration_bounds = array<i64: 5, 1>, scalar_prefetch = 1 : i64, scratch_operands = 0 : i64, tpu.core_type = #tpu.core_type<tc>, window_params = [{transform_indices = @transform_0, window_bounds = array<i64: 32, 32>}, {transform_indices = @transform_1, window_bounds = array<i64: 32, 1>}, {transform_indices = @transform_2, window_bounds = array<i64: 1, 32, 64>}, {transform_indices = @transform_3, window_bounds = array<i64: 1, 32, 64>}, {transform_indices = @transform_4, window_bounds = array<i64: 1, 64, 32>}, {transform_indices = @transform_5, window_bounds = array<i64: 32, 32>}]} {
    %c0_i32 = arith.constant 0 : i32
    %0 = arith.cmpi eq, %arg1, %c0_i32 : i32
    %1 = arith.extui %0 : i1 to i32
    %c0_i32_0 = arith.constant 0 : i32
    %2 = arith.cmpi ne, %1, %c0_i32_0 : i32
    scf.if %2 {
      %cst_20 = arith.constant 0.000000e+00 : f32
      %27 = vector.broadcast %cst_20 : f32 to vector<32x32xf32>
      %c0_21 = arith.constant 0 : index
      %c0_22 = arith.constant 0 : index
      %28 = vector.load %arg8[%c0_21, %c0_22] : memref<32x32xf32, #tpu.memory_space<vmem>>, vector<32x32xf32>
      tpu.vector_store %arg8[%c0_21, %c0_22], %27 {strides = array<i32>} : memref<32x32xf32, #tpu.memory_space<vmem>>, vector<32x32xf32>,
    } else {
    }
    %c0 = arith.constant 0 : index
    %c0_1 = arith.constant 0 : index
    %3 = vector.load %arg3[%c0, %c0_1] : memref<32x32xbf16, #tpu.memory_space<vmem>>, vector<32x32xbf16>
    %c0_2 = arith.constant 0 : index
    %c0_3 = arith.constant 0 : index
    %c0_4 = arith.constant 0 : index
    %4 = vector.load %arg5[%c0_2, %c0_3, %c0_4] : memref<1x32x64xbf16, #tpu.memory_space<vmem>>, vector<1x32x64xbf16>
    %5 = vector.shape_cast %4 : vector<1x32x64xbf16> to vector<32x64xbf16>
    %cst = arith.constant dense<0.000000e+00> : vector<32x64xf32>
    %6 = tpu.matmul %3, %5, %cst {dimension_numbers = #tpu.dot_dimension_numbers<[1], [0], [0], [1], [0, 0, 1, 1], [], []>} : vector<32x32xbf16>, vector<32x64xbf16>, vector<32x64xf32> -> vector<32x64xf32>
    %c0_5 = arith.constant 0 : index
    %c0_6 = arith.constant 0 : index
    %c0_7 = arith.constant 0 : index
    %7 = vector.load %arg6[%c0_5, %c0_6, %c0_7] : memref<1x32x64xbf16, #tpu.memory_space<vmem>>, vector<1x32x64xbf16>
    %8 = vector.shape_cast %7 : vector<1x32x64xbf16> to vector<32x64xbf16>
    %cst_8 = arith.constant dense<0.000000e+00> : vector<32x64xf32>
    %9 = tpu.matmul %3, %8, %cst_8 {dimension_numbers = #tpu.dot_dimension_numbers<[1], [0], [0], [1], [0, 0, 1, 1], [], []>} : vector<32x32xbf16>, vector<32x64xbf16>, vector<32x64xf32> -> vector<32x64xf32>
    %10 = arith.negf %6 : vector<32x64xf32>
    %11 = math.exp %10 : vector<32x64xf32>
    %cst_9 = arith.constant 1.000000e+00 : f32
    %12 = vector.broadcast %cst_9 : f32 to vector<32x64xf32>
    %13 = arith.addf %12, %11 : vector<32x64xf32>
    %14 = arith.divf %12, %13 : vector<32x64xf32>
    %15 = arith.mulf %6, %14 : vector<32x64xf32>
    %16 = arith.mulf %15, %9 : vector<32x64xf32>
    %c0_10 = arith.constant 0 : index
    %c0_11 = arith.constant 0 : index
    %17 = vector.load %arg4[%c0_10, %c0_11] : memref<32x1xf32, #tpu.memory_space<vmem>>, vector<32x1xf32>
    %18 = vector.broadcast %17 : vector<32x1xf32> to vector<32x64xf32>
    %19 = arith.mulf %16, %18 : vector<32x64xf32>
    %c0_12 = arith.constant 0 : index
    %c0_13 = arith.constant 0 : index
    %20 = vector.load %arg8[%c0_12, %c0_13] : memref<32x32xf32, #tpu.memory_space<vmem>>, vector<32x32xf32>
    %21 = arith.truncf %19 : vector<32x64xf32> to vector<32x64xbf16>
    %c0_14 = arith.constant 0 : index
    %c0_15 = arith.constant 0 : index
    %c0_16 = arith.constant 0 : index
    %22 = vector.load %arg7[%c0_14, %c0_15, %c0_16] : memref<1x64x32xbf16, #tpu.memory_space<vmem>>, vector<1x64x32xbf16>
    %23 = vector.shape_cast %22 : vector<1x64x32xbf16> to vector<64x32xbf16>
    %cst_17 = arith.constant dense<0.000000e+00> : vector<32x32xf32>
    %24 = tpu.matmul %21, %23, %cst_17 {dimension_numbers = #tpu.dot_dimension_numbers<[1], [0], [0], [1], [0, 0, 1, 1], [], []>} : vector<32x64xbf16>, vector<64x32xbf16>, vector<32x32xf32> -> vector<32x32xf32>
    %25 = arith.addf %20, %24 : vector<32x32xf32>
    %c0_18 = arith.constant 0 : index
    %c0_19 = arith.constant 0 : index
    %26 = vector.load %arg8[%c0_18, %c0_19] : memref<32x32xf32, #tpu.memory_space<vmem>>, vector<32x32xf32>
    tpu.vector_store %arg8[%c0_18, %c0_19], %25 {strides = array<i32>} : memref<32x32xf32, #tpu.memory_space<vmem>>, vector<32x32xf32>,
    return
  }
  func.func @transform_0(%arg0: i32, %arg1: i32, %arg2: memref<5xi32, #tpu.memory_space<smem>>) -> (i32, i32) {
    %c0_i32 = arith.constant 0 : i32
    %c0_i32_0 = arith.constant 0 : i32
    return %arg0, %c0_i32 : i32, i32
  }
  func.func @transform_1(%arg0: i32, %arg1: i32, %arg2: memref<5xi32, #tpu.memory_space<smem>>) -> (i32, i32) {
    %c0_i32 = arith.constant 0 : i32
    %c0_i32_0 = arith.constant 0 : i32
    return %arg0, %c0_i32 : i32, i32
  }
  func.func @transform_2(%arg0: i32, %arg1: i32, %arg2: memref<5xi32, #tpu.memory_space<smem>>) -> (i32, i32, i32) {
    %0 = arith.index_cast %arg0 : i32 to index
    %1 = memref.load %arg2[%0] : memref<5xi32, #tpu.memory_space<smem>>
    %c0_i32 = arith.constant 0 : i32
    %c0_i32_0 = arith.constant 0 : i32
    return %1, %c0_i32, %arg1 : i32, i32, i32
  }
  func.func @transform_3(%arg0: i32, %arg1: i32, %arg2: memref<5xi32, #tpu.memory_space<smem>>) -> (i32, i32, i32) {
    %0 = arith.index_cast %arg0 : i32 to index
    %1 = memref.load %arg2[%0] : memref<5xi32, #tpu.memory_space<smem>>
    %c0_i32 = arith.constant 0 : i32
    %c0_i32_0 = arith.constant 0 : i32
    return %1, %c0_i32, %arg1 : i32, i32, i32
  }
  func.func @transform_4(%arg0: i32, %arg1: i32, %arg2: memref<5xi32, #tpu.memory_space<smem>>) -> (i32, i32, i32) {
    %0 = arith.index_cast %arg0 : i32 to index
    %1 = memref.load %arg2[%0] : memref<5xi32, #tpu.memory_space<smem>>
    %c0_i32 = arith.constant 0 : i32
    %c0_i32_0 = arith.constant 0 : i32
    return %1, %arg1, %c0_i32 : i32, i32, i32
  }
  func.func @transform_5(%arg0: i32, %arg1: i32, %arg2: memref<5xi32, #tpu.memory_space<smem>>) -> (i32, i32) {
    %c0_i32 = arith.constant 0 : i32
    %c0_i32_0 = arith.constant 0 : i32
    return %arg0, %c0_i32 : i32, i32
  }
}

</mosaic_0001>

<bundles_post_ra>
// kernel: custom-call.1
= control target key start
LH: loop header
LB: loop body
LE: loop exit
PB: predicated region body
PF: predicated region fallthrough
CT: control target
= control target key end

     0   :  { %s6_s0 = inlined_call_operand.vmem [shape: u32[5], index: 0, kind: output, shape index: {}]  }

// kernel: eq.8
= control target key start
LH: loop header
LB: loop body
LE: loop exit
PB: predicated region body
PF: predicated region fallthrough
CT: control target
= control target key end

     0   :  { %s131_s10 = smov 30   ;;  %s132_s11 = smov 26   ;;  %vm3_vm0 = vcmask 15360   ;;  %vm9_vm1 = vcmask 261360   ;;  %vm15_vm2 = vcmask 244960   ;;  %vm21_vm3 = vcmask 228560   ;;  %s207_s0 = inlined_call_operand.vmem [shape: s32[16,2], index: 0, kind: input, shape index: {}]   ;;  %s208_s1 = inlined_call_operand.vmem [shape: s32[32], index: 1, kind: output, shape index: {}]  }
   0x1   :  { %v101_v0 = vld [vmem:[%s207_s0 + $0xf] sm:$0x1]   ;;  %v103_v1 = vld [vmem:[%s207_s0 + $0xd] sm:$0x1]   ;;  %v102_v2 = vld [vmem:[%s207_s0 + $0xe] sm:$0x1]  }
   0x2   :  { %7 = vrot.lane.b32.xlu0 %v101_v0, %s131_s10  ;;  %19 = vrot.lane.b32.xlu1 %v103_v1, %s132_s11  ;;  %v104_v3 = vld [vmem:[%s207_s0 + $0xc] sm:$0x1]   ;;  %s133_s16 = smov 28   ;;  %s134_s17 = smov 24   ;;  %v105_v4 = vld [vmem:[%s207_s0 + $0xb] sm:$0x1]  }
   0x3   :  { %v106_v5 = vld [vmem:[%s207_s0 + $0xa] sm:$0x1]   ;;  %v2_v6 = vld [vmem:[%s207_s0] sm:$0x1]   ;;  %s135_s24 = smov 22   ;;  %s136_s25 = smov 20  }
   0x4   :  { %4 = vst.msk [vmem:[#allocation0] sm:$0x1] %vm3_vm0, %v2_v6   ;;  %v107_v7 = vld [vmem:[%s207_s0 + $0x9] sm:$0x1]   ;;  %v108_v8 = vld [vmem:[%s207_s0 + $0x8] sm:$0x1]  }
   0x5   :  { %s137_s30 = smov 18   ;;  %s138_s2 = smov 16   ;;  %v109_v9 = vld [vmem:[%s207_s0 + $0x7] sm:$0x1]   ;;  %v110_v10 = vld [vmem:[%s207_s0 + $0x6] sm:$0x1]  }
   0x6   :  { %13 = vrot.lane.b32.xlu0 %v102_v2, %s133_s16  ;;  %25 = vrot.lane.b32.xlu1 %v104_v3, %s134_s17  ;;  %s139_s7 = smov 14   ;;  %s140_s8 = smov 12   ;;  %v111_v11 = vld [vmem:[%s207_s0 + $0x5] sm:$0x1]   ;;  %v112_v12 = vld [vmem:[%s207_s0 + $0x4] sm:$0x1]  }
   0x7   :  { %s141_s13 = smov 10   ;;  %s142_s14 = smov 8   ;;  %v113_v13 = vld [vmem:[%s207_s0 + $0x3] sm:$0x1]   ;;  %v114_v14 = vld [vmem:[%s207_s0 + $0x2] sm:$0x1]  }
   0x8   :  { %s143_s19 = smov 6   ;;  %s144_s20 = smov 4   ;;  %v115_v15 = vld [vmem:[%s207_s0 + $0x1] sm:$0x1]   ;;  %vm27_vm4 = vcmask 212160   ;;  %vm33_vm5 = vcmask 195760  }
   0x9   :  { %s145_s0 = smov 2   ;;  %vm39_vm6 = vcmask 179360   ;;  %vm45_vm7 = vcmask 162960   ;;  %vm51_vm8 = vcmask 146560   ;;  %vm57_vm9 = vcmask 130160  }
   0xa   :  { %31 = vrot.lane.b32.xlu0 %v105_v4, %s135_s24  ;;  %37 = vrot.lane.b32.xlu1 %v106_v5, %s136_s25  ;;  %vm63_vm10 = vcmask 113760   ;;  %vm69_vm11 = vcmask 97360   ;;  %vm75_vm12 = vcmask 80960   ;;  %vm81_vm13 = vcmask 64560  }
   0xb   :  { %vm87_vm14 = vcmask 48160   ;;  %vm93_vm15 = vcmask 31760  }
   0xe   :  { %43 = vrot.lane.b32.xlu0 %v107_v7, %s137_s30  ;;  %49 = vrot.lane.b32.xlu1 %v108_v8, %s138_s2 }
  0x12   :  { %55 = vrot.lane.b32.xlu0 %v109_v9, %s139_s7  ;;  %61 = vrot.lane.b32.xlu1 %v110_v10, %s140_s8 }
  0x16   :  { %67 = vrot.lane.b32.xlu0 %v111_v11, %s141_s13  ;;  %73 = vrot.lane.b32.xlu1 %v112_v12, %s142_s14 }
  0x1a   :  { %79 = vrot.lane.b32.xlu0 %v113_v13, %s143_s19  ;;  %85 = vrot.lane.b32.xlu1 %v114_v14, %s144_s20 }
  0x1e   :  { %91 = vrot.lane.b32.xlu0 %v115_v15, %s145_s0 }
  0x74   :  { %v8_v16 = vpop.permute.xlu0 %7   ;;  %v20_v17 = vpop.permute.xlu1 %19  }
  0x75   :  { %10 = vst.msk [vmem:[#allocation0] sm:$0x1] %vm9_vm1, %v8_v16  }
  0x78   :  { %v14_v18 = vpop.permute.xlu0 %13   ;;  %v26_v19 = vpop.permute.xlu1 %25  }
  0x79   :  { %16 = vst.msk [vmem:[#allocation0] sm:$0x1] %vm15_vm2, %v14_v18  }
  0x7a   :  { %22 = vst.msk [vmem:[#allocation0] sm:$0x1] %vm21_vm3, %v20_v17  }
  0x7b   :  { %28 = vst.msk [vmem:[#allocation0] sm:$0x1] %vm27_vm4, %v26_v19  }
  0x7c   :  { %v32_v20 = vpop.permute.xlu0 %31   ;;  %v38_v21 = vpop.permute.xlu1 %37  }
  0x7d   :  { %34 = vst.msk [vmem:[#allocation0] sm:$0x1] %vm33_vm5, %v32_v20  }
  0x7e   :  { %40 = vst.msk [vmem:[#allocation0] sm:$0x1] %vm39_vm6, %v38_v21  }
  0x80   :  { %v44_v22 = vpop.permute.xlu0 %43   ;;  %v50_v23 = vpop.permute.xlu1 %49  }
  0x81   :  { %46 = vst.msk [vmem:[#allocation0] sm:$0x1] %vm45_vm7, %v44_v22  }
  0x82   :  { %52 = vst.msk [vmem:[#allocation0] sm:$0x1] %vm51_vm8, %v50_v23  }
  0x84   :  { %v56_v24 = vpop.permute.xlu0 %55   ;;  %v62_v25 = vpop.permute.xlu1 %61  }
  0x85   :  { %58 = vst.msk [vmem:[#allocation0] sm:$0x1] %vm57_vm9, %v56_v24  }
  0x86   :  { %64 = vst.msk [vmem:[#allocation0] sm:$0x1] %vm63_vm10, %v62_v25  }
  0x88   :  { %v68_v26 = vpop.permute.xlu0 %67   ;;  %v74_v27 = vpop.permute.xlu1 %73  }
  0x89   :  { %70 = vst.msk [vmem:[#allocation0] sm:$0x1] %vm69_vm11, %v68_v26  }
  0x8a   :  { %76 = vst.msk [vmem:[#allocation0] sm:$0x1] %vm75_vm12, %v74_v27  }
  0x8c   :  { %v80_v28 = vpop.permute.xlu0 %79   ;;  %v86_v29 = vpop.permute.xlu1 %85  }
  0x8d   :  { %82 = vst.msk [vmem:[#allocation0] sm:$0x1] %vm81_vm13, %v80_v28  }
  0x8e   :  { %88 = vst.msk [vmem:[#allocation0] sm:$0x1] %vm87_vm14, %v86_v29  }
  0x90   :  { %v92_v30 = vpop.permute.xlu0 %91  }
  0x91   :  { %94 = vst.msk [vmem:[#allocation0] sm:$0x1] %vm93_vm15, %v92_v30  }
  0x98   :  { %v98_v31 = vld [vmem:[#allocation0] sm:$0x1] }
  0x99   :  { %100 = vst [vmem:[%s208_s1] sm:$0x1] %v98_v31 }

// kernel: moe_forward.1
= control target key start
LH: loop header
LB: loop body
LE: loop exit
PB: predicated region body
PF: predicated region fallthrough
CT: control target
= control target key end

     0   :  { %s2269_s0 = inlined_call_operand.hbm [shape: s32[5], index: 0, kind: input, shape index: {}]   ;;  %s2270_s1 = inlined_call_operand.hbm [shape: bf16[160,32], index: 1, kind: input, shape index: {}]   ;;  %s2271_s2 = inlined_call_operand.hbm [shape: f32[160,1], index: 2, kind: input, shape index: {}]   ;;  %s2272_s3 = inlined_call_operand.hbm [shape: bf16[4,32,64], index: 3, kind: input, shape index: {}]   ;;  %s2273_s4 = inlined_call_operand.hbm [shape: bf16[4,32,64], index: 4, kind: input, shape index: {}]   ;;  %s2274_s5 = inlined_call_operand.hbm [shape: bf16[4,64,32], index: 5, kind: input, shape index: {}]   ;;  %s2275_s6 = inlined_call_operand.hbm [shape: f32[160,32], index: 6, kind: output, shape index: {}]  }
   0x1   :  { %2301 = sst [smem:[#allocation41_spill]] %s2271_s2  ;;  %s1253_s23 = scalar_lea.hbm %s2269_s0, 16 }
   0x2   :  { %2302 = sst [smem:[#allocation42_spill]] %s2272_s3  ;;  %p1254_p0 = scmp.ne.s32.totalorder %s2269_s0, %s1253_s23 }
   0x3   :  { %2303 = sst [smem:[#allocation43_spill]] %s2274_s5  ;;  %p1257_p1 = scmp.lt.u32.totalorder %s1253_s23, %s2269_s0 }
   0x4   :  { %2304 = sst [smem:[#allocation44_spill]] %s2275_s6 }
   0x5   :  { %p1259_p2 = pnand %p1257_p1, %p1254_p0 }
   0x7   :  { %1262 = shalt.err (!%p1259_p2)  }
   0x8   :  { %s1587_s28 = smov [#allocation3]  }
   0x9   :  { %12 = dma.hbm_to_smem %s2269_s0, 16, %s1587_s28, [#allocation2] }
   0xa   :  { %1501 = dma.done.wait [#allocation2], 16 }
   0xb   :  { %1502 = vsyncadd [#allocation2], 4294967280 }
   0xc   :  { %14 = sfence }
   0xd   :  { %15 = vsyncpa [#allocation5], 0 }
   0xe   :  { %17 = vsyncpa [#allocation5 + $0x1], 0 }
   0xf   :  { %18 = vsyncpa [#allocation8], 0 }
  0x10   :  { %20 = vsyncpa [#allocation8 + $0x1], 0 }
  0x11   :  { %21 = vsyncpa [#allocation11], 0 }
  0x12   :  { %23 = vsyncpa [#allocation11 + $0x1], 0 }
  0x13   :  { %24 = vsyncpa [#allocation6], 0 }
  0x14   :  { %26 = vsyncpa [#allocation6 + $0x1], 0  ;;  %s1649_s7 = smov 0   ;;  %s1651_s8 = smov 0  }
  0x15   :  { %s1653_s9 = smov 0   ;;  %s1655_s10 = smov 0  }
  0x16   :  { %s1657_s0 = smov 0   ;;  %s1659_s11 = smov 0  }
  0x17   :  { %s1661_s12 = smov 0   ;;  %s1663_s13 = smov 0  }
  0x18   :  { %s1665_s14 = smov 0   ;;  %s1667_s15 = smov 0  }
  0x19   :  { %s1669_s16 = smov 0   ;;  %s1671_s17 = smov 0  }
  0x1a   :  { %s1673_s18 = smov 0   ;;  %s1675_s19 = smov 0  }
  0x1b   :  { %s1677_s20 = smov 0  }
  0x1c LB: > { %2305 = sst [smem:[#allocation27_spill]] %s1545_s0  ;;  %s1725_s21 = sadd.s32 4294967295, %s1585_s20   ;;  %s1585_s20 = sphi %s1677_s20, %s32_s20   ;;  %s1581_s19 = sphi %s1675_s19, %s2390_s19   ;;  %s1577_s18 = sphi %s1673_s18, %s2389_s18   ;;  %s1573_s17 = sphi %s1671_s17, %s2380_s17   ;;  %s1569_s16 = sphi %s1669_s16, %s2388_s16   ;;  %s1565_s15 = sphi %s1667_s15, %s2378_s15   ;;  %s1561_s14 = sphi %s1665_s14, %s2387_s14   ;;  %s1557_s13 = sphi %s1663_s13, %s2386_s13   ;;  %s1553_s12 = sphi %s1661_s12, %s2385_s12   ;;  %s1549_s11 = sphi %s1659_s11, %s2377_s11   ;;  %s1545_s0 = sphi %s1657_s0, %s2376_s0   ;;  %s1541_s10 = sphi %s1655_s10, %s2375_s10   ;;  %s1537_s9 = sphi %s1653_s9, %s2384_s9   ;;  %s1533_s8 = sphi %s1651_s8, %s2383_s8   ;;  %s1529_s7 = sphi %s1649_s7, %s2382_s7  }
  0x1d   : > { %2306 = sst [smem:[#allocation28_spill]] %s1549_s11  ;;  %s952_s22 = sadd.s32 4294967294, %s1585_s20  }
  0x1e   : > { %2307 = sst [smem:[#allocation29_spill]] %s1565_s15  ;;  %s44_s23 = sadd.s32 1, %s1581_s19 }
  0x1f   : > { %2308 = sst [smem:[#allocation30_spill]] %s1569_s16  ;;  %s51_s24 = sadd.s32 1, %s1573_s17 }
  0x20   : > { %2309 = sst [smem:[#allocation31_spill]] %s1573_s17  ;;  %p46_p3 = scmp.ge.s32.totalorder %s44_s23, 5 }
  0x21   : > { %2310 = sst [smem:[#allocation32_spill]] %s1577_s18  ;;  %p58_p4 = scmp.ne.s32.totalorder %s1573_s17, %s1569_s16 }
  0x22   : > { %p2287_p5 = scmp.eq.s32.totalorder %s1585_s20, 0  ;;  %p64_p6 = scmp.ne.s32.totalorder %s1569_s16, %s1565_s15 }
  0x23   : > { %s2392_s23 = smov (%p46_p3, %s44_s23), 0  ;;  %p2286_p8 = scmp.eq.s32.totalorder %s1725_s21, 0 }
  0x24   : > { %p1739_p7 = por %p2287_p5, %p58_p4  ;;  %s48_s26 = ssub.s32 %s1581_s19, %s2392_s23 }
  0x25   : > { %p204_p9 = scmp.eq.s32.totalorder %s1725_s21, 4  ;;  %p49_p10 = scmp.eq.s32.totalorder %s48_s26, 0 }
  0x26   : > { %p1749_p11 = por %p2286_p8, %p64_p6  ;;  %p210_p13 = scmp.eq.s32.totalorder %s952_s22, 4 }
  0x27   : > { %p1753_p12 = por %p204_p9, %p58_p4  ;;  %p2285_p1 = scmp.lt.s32.totalorder %s1585_s20, 5 }
  0x28   : > { %s2312_s27 = scalar_select %p1749_p11, 1, 0 }
  0x29   : > { %s2314_s28 = scalar_select %p1753_p12, 1, 0 }
  0x2a   : > { %2313 = sst [smem:[#allocation33_spill]] %s2312_s27  ;;  %p1760_p0 = por %p210_p13, %p64_p6 }
  0x2b   : > { %2315 = sst [smem:[#allocation34_spill]] %s2314_s28  ;;  %s1766_s15 = sand.u32 1, %s1573_s17  }
  0x2c   : > { %s1758_s29 = scalar_select %p49_p10, %s1573_s17, %s51_s24  }
  0x2d   : > { %s2317_s30 = scalar_select %p1760_p0, 1, 0 }
  0x2e   : > { %2316 = sst [smem:[#allocation35_spill]] %s1758_s29  ;;  %s958_s6 = sshll.u32 %s1766_s15, 5 }
  0x2f   : > { %2318 = sst [smem:[#allocation36_spill]] %s2317_s30  ;;  %p1774_p2 = pnand %p2285_p1, %p1739_p7 }
  0x30   : > { %s1003_s22 = sshll.u32 %s1581_s19, 9  ;;  %s2320_s2 = sld [smem:[#allocation41_spill]] }
  0x31   : > { %s255_s26 = scalar_lea.vmem [#allocation7], %s958_s6  ;;  %s2321_s25 = sand.u32 1, %s1585_s20  }
  0x32   : > { %s262_s17 = sshll.u32 %s255_s26, 4  ;;  %s1788_s30 = scalar_lea.sflag [#allocation8], %s2321_s25  ;;  %s1784_s17 = int_to_ptr.vmem [resolvable:$true] %s262_s17 }
  0x33   : > { %2322 = sst [smem:[#allocation37_spill]] %s1788_s30  ;;  %p2297_p4 = pneg %p1774_p2 }
  0x36   : > { %s1782_s28 = scalar_lea.hbm %s2320_s2, %s1003_s22  ;;  %s1268_s24 = scalar_lea.hbm %s2320_s2, 2560 }
  0x37   : > { %s1263_s27 = scalar_lea.hbm %s1782_s28, 512  ;;  %p1269_p9 = scmp.lt.u32.totalorder %s1782_s28, %s2320_s2 }
  0x38   : > { %p1264_p3 = scmp.ne.s32.totalorder %s1782_s28, %s1263_s27  ;;  %p1270_p10 = scmp.lt.u32.totalorder %s1268_s24, %s1263_s27 }
  0x39   : > { %p1272_p1 = scmp.lt.u32.totalorder %s1263_s27, %s1782_s28 }
  0x3a   : > { %p1266_p6 = pnand %p2297_p4, %p1264_p3  ;;  %p1271_p13 = por %p1270_p10, %p1269_p9 }
  0x3c   : > { %p1267_p7 = pneg %p1266_p6  ;;  %p1273_p8 = por %p1272_p1, %p1271_p13 }
  0x3e   : > { %p1274_p5 = pnand %p1273_p8, %p1267_p7 }
  0x40   : > { %1277 = shalt.err (!%p1274_p5)
}
  0x41   : > { %s1278_s26 = scalar_lea.vmem %s1784_s17, 512  ;;  %s1588_s25 = smov [#allocation7]  }
  0x42   : > { %p1279_p3 = scmp.ne.s32.totalorder %s1784_s17, %s1278_s26  ;;  %s1283_s29 = sshll.u32 %s1588_s25, 4  ;;  %s1284_s29 = int_to_ptr.vmem [resolvable:$false] %s1283_s29 }
  0x43   : > { %s1285_s16 = scalar_lea.vmem %s1284_s29, 1024  ;;  %p1286_p12 = scmp.lt.s32.totalorder %s1784_s17, %s1284_s29 }
  0x44   : > { %p1281_p6 = pnand %p1279_p3, %p2297_p4  ;;  %p1287_p9 = scmp.lt.s32.totalorder %s1285_s16, %s1278_s26 }
  0x46   : > { %p1282_p0 = pneg %p1281_p6  ;;  %p1288_p10 = por %p1287_p9, %p1286_p12 }
  0x48   : > { %p1289_p1 = pnand %p1288_p10, %p1282_p0 }
  0x4a   : > { %1292 = shalt.err (!%p1289_p1)
}
  0x4b   : > { %s1589_s27 = smov 128   ;;  %s1590_s22 = smov 8  }
  0x4c   : > { %1074 = dma.hbm_to_vmem [thread:$0]  (!%p1774_p2), %s1782_s28, 512, %s1784_s17, %s1788_s30, %s1589_s27, %s1589_s27, %s1590_s22  }
  0x4d   : > { %p970_p5 = scmp.ge.s32.totalorder %s1585_s20, 1  ;;  %p340_p8 = scmp.lt.s32.totalorder %s1585_s20, 6 }
  0x4e   : > { %s130_s6 = sld [smem:[#allocation3 + %s1581_s19]]  ;;  %s137_s25 = sadd.s32 1, %s1549_s11 }
  0x4f   : > { %p1818_p12 = pnand %p970_p5, %p340_p8  ;;  %s131_s26 = sld [smem:[#allocation3 + %s2392_s23]] }
  0x50   : > { %p144_p0 = scmp.ne.s32.totalorder %s1549_s11, %s1545_s0  ;;  %p150_p7 = scmp.ne.s32.totalorder %s1545_s0, %s1541_s10 }
  0x51   : > { %s2323_s24 = scalar_select %p1818_p12, 1, 0 }
  0x52   : > { %p2325_p13 = scmp.eq.s32.totalorder %s1585_s20, 0  ;;  %p2327_p6 = scmp.eq.s32.totalorder %s1725_s21, 0 }
  0x53   : > { %2324 = sst [smem:[#allocation38_spill]] %s2323_s24  ;;  %s297_s28 = sand.u32 1, %s1549_s11  }
  0x54   : > { %p1831_p3 = por %p144_p0, %p2325_p13  ;;  %p1837_p9 = por %p150_p7, %p2327_p6 }
  0x55   : > { %s964_s16 = sshll.u32 %s297_s28, 4  ;;  %p2330_p10 = scmp.lt.s32.totalorder %s1585_s20, 5 }
  0x56   : > { %s2328_s17 = scalar_select %p1837_p9, 1, 0 }
  0x57   : > { %p1846_p1 = pnand %p2330_p10, %p1831_p3  ;;  %s132_s27 = ssub.s32 %s130_s6, %s131_s26 }
  0x58   : > { %2329 = sst [smem:[#allocation39_spill]] %s2328_s17  ;;  %p135_p5 = scmp.eq.s32.totalorder %s132_s27, 0 }
  0x59   : > { %s299_s22 = scalar_lea.vmem [#allocation10], %s964_s16  ;;  %p2333_p8 = pmov %p2330_p10 }
  0x5a   : > { %s308_s2 = sshll.u32 %s299_s22, 4  ;;  %s955_s6 = sshll.u32 %s1766_s15, 4  ;;  %s1862_s2 = int_to_ptr.vmem [resolvable:$true] %s308_s2 }
  0x5b   : > { %s1055_s0 = scalar_select %p1831_p3, [#allocation3], [#allocation15] }
  0x5c   : > { %s1853_s24 = scalar_select %p135_p5, %s1549_s11, %s137_s25  }
  0x5d   : > { %s1056_s17 = scalar_select %p1831_p3, %s1581_s19, 0 }
  0x5e   : > { %2332 = sst [smem:[#allocation40_spill]] %s1853_s24  ;;  %s2394_s0 = smov (!%p2333_p8, %s1055_s0), [#allocation18] }
  0x5f   : > { %p2334_p0 = pmov %p2333_p8  ;;  %s1002_s26 = sshll.u32 %s1581_s19, 8 }
  0x60   : > { %s1869_s22 = scalar_lea.hbm %s2270_s1, %s1002_s26  ;;  %s234_s25 = scalar_lea.vmem [#allocation4], %s955_s6 }
  0x61   : > { %s2396_s17 = smov (!%p2334_p0, %s1056_s17), 0  ;;  %s241_s24 = sshll.u32 %s234_s25, 4  ;;  %s1871_s24 = int_to_ptr.vmem [resolvable:$true] %s241_s24 }
  0x62   : > { %s300_s28 = sld [smem:[%s2394_s0 + %s2396_s17]]  ;;  %s2335_s3 = sand.u32 1, %s1585_s20  }
  0x63   : > { %s1880_s0 = scalar_lea.sflag [#allocation11], %s2335_s3  ;;  %p1295_p13 = pneg %p1846_p1 }
  0x64   : > { %s1298_s5 = scalar_lea.hbm %s2273_s4, 1024 }
  0x68   : > { %s1005_s29 = sshll.u32 %s300_s28, 8 }
  0x69   : > { %s1876_s30 = scalar_lea.hbm %s2273_s4, %s1005_s29 }
  0x6a   : > { %s1293_s17 = scalar_lea.hbm %s1876_s30, 256  ;;  %p1299_p10 = scmp.lt.u32.totalorder %s1876_s30, %s2273_s4 }
  0x6b   : > { %p1294_p7 = scmp.ne.s32.totalorder %s1876_s30, %s1293_s17  ;;  %p1300_p5 = scmp.lt.u32.totalorder %s1298_s5, %s1293_s17 }
  0x6c   : > { %p1302_p0 = scmp.lt.u32.totalorder %s1293_s17, %s1876_s30 }
  0x6d   : > { %p1296_p3 = pnand %p1295_p13, %p1294_p7  ;;  %p1301_p8 = por %p1300_p5, %p1299_p10 }
  0x6f   : > { %p1297_p6 = pneg %p1296_p3  ;;  %p1303_p4 = por %p1302_p0, %p1301_p8 }
  0x71   : > { %p1304_p9 = pnand %p1303_p4, %p1297_p6 }
  0x73   : > { %1307 = shalt.err (!%p1304_p9)
}
  0x74   : > { %s1308_s3 = scalar_lea.vmem %s1862_s2, 256  ;;  %s1591_s16 = smov [#allocation10]  }
  0x75   : > { %p1309_p7 = scmp.ne.s32.totalorder %s1862_s2, %s1308_s3  ;;  %s1313_s27 = sshll.u32 %s1591_s16, 4  ;;  %s1314_s27 = int_to_ptr.vmem [resolvable:$false] %s1313_s27 }
  0x76   : > { %s1315_s25 = scalar_lea.vmem %s1314_s27, 512  ;;  %p1316_p12 = scmp.lt.s32.totalorder %s1862_s2, %s1314_s27 }
  0x77   : > { %p1311_p3 = pnand %p1309_p7, %p1295_p13  ;;  %p1317_p10 = scmp.lt.s32.totalorder %s1315_s25, %s1308_s3 }
  0x79   : > { %p1312_p11 = pneg %p1311_p3  ;;  %p1318_p5 = por %p1317_p10, %p1316_p12 }
  0x7b   : > { %p1319_p8 = pnand %p1318_p5, %p1312_p11 }
  0x7d   : > { %1322 = shalt.err (!%p1319_p8)
}
  0x7e   : > { %s1592_s29 = smov 64   ;;  %s1593_s17 = smov 4  }
  0x7f   : > { %1084 = dma.hbm_to_vmem [thread:$0]  (!%p1846_p1), %s1876_s30, 256, %s1862_s2, %s1880_s0, %s1592_s29, %s1592_s29, %s1593_s17  }
  0x80   : > { %s231_s28 = scalar_lea.sflag [#allocation5], %s1766_s15  ;;  %s1323_s6 = scalar_lea.hbm %s1869_s22, 256 }
  0x81   : > { %p1324_p11 = scmp.ne.s32.totalorder %s1869_s22, %s1323_s6  ;;  %p2336_p4 = pneg %p1774_p2 }
  0x82   : > { %s1328_s26 = scalar_lea.hbm %s2270_s1, 1280  ;;  %p1329_p13 = scmp.lt.u32.totalorder %s1869_s22, %s2270_s1 }
  0x83   : > { %p1326_p12 = pnand %p1324_p11, %p2336_p4  ;;  %p1330_p6 = scmp.lt.u32.totalorder %s1328_s26, %s1323_s6 }
  0x84   : > { %p1332_p7 = scmp.lt.u32.totalorder %s1323_s6, %s1869_s22 }
  0x85   : > { %p1327_p9 = pneg %p1326_p12  ;;  %p1331_p0 = por %p1330_p6, %p1329_p13 }
  0x87   : > { %p1333_p3 = por %p1332_p7, %p1331_p0 }
  0x89   : > { %p1334_p1 = pnand %p1333_p3, %p1327_p9 }
  0x8b   : > { %1337 = shalt.err (!%p1334_p1)
}
  0x8c   : > { %s1338_s2 = scalar_lea.vmem %s1871_s24, 256  ;;  %p2337_p5 = pmov %p2336_p4 }
  0x8d   : > { %p1339_p10 = scmp.ne.s32.totalorder %s1871_s24, %s1338_s2  ;;  %s1594_s30 = smov [#allocation4]  }
  0x8e   : > { %s1343_s10 = sshll.u32 %s1594_s30, 4  ;;  %s1344_s10 = int_to_ptr.vmem [resolvable:$false] %s1343_s10 }
  0x8f   : > { %p1341_p8 = pnand %p1339_p10, %p2337_p5  ;;  %s1345_s27 = scalar_lea.vmem %s1344_s10, 512 }
  0x90   : > { %p1346_p4 = scmp.lt.s32.totalorder %s1871_s24, %s1344_s10  ;;  %p1347_p12 = scmp.lt.s32.totalorder %s1345_s27, %s1338_s2 }
  0x91   : > { %p1342_p11 = pneg %p1341_p8 }
  0x92   : > { %p1348_p13 = por %p1347_p12, %p1346_p4 }
  0x94   : > { %p1349_p6 = pnand %p1348_p13, %p1342_p11 }
  0x96   : > { %1352 = shalt.err (!%p1349_p6)
}
  0x97   : > { %1071 = dma.hbm_to_vmem [thread:$0]  (!%p1774_p2), %s1869_s22, 256, %s1871_s24, %s231_s28, %s1592_s29, %s1592_s29, %s1593_s17  }
  0x98   : > { %s100_s18 = sld [smem:[#allocation3 + %s1581_s19]]  ;;  %p114_p9 = scmp.ne.s32.totalorder %s1561_s14, %s1557_s13 }
  0x99   : > { %s101_s25 = sld [smem:[#allocation3 + %s2392_s23]]  ;;  %p120_p0 = scmp.ne.s32.totalorder %s1557_s13, %s1553_s12 }
  0x9a   : > { %s274_s15 = sand.u32 1, %s1561_s14   ;;  %p2338_p7 = scmp.eq.s32.totalorder %s1585_s20, 0 }
  0x9b   : > { %s961_s5 = sshll.u32 %s274_s15, 4  ;;  %p2340_p2 = scmp.eq.s32.totalorder %s1725_s21, 0 }
  0x9c   : > { %p1949_p3 = por %p114_p9, %p2338_p7  ;;  %s107_s28 = sadd.s32 1, %s1561_s14 }
  0x9d   : > { %p1955_p1 = por %p120_p0, %p2340_p2  ;;  %s276_s11 = scalar_lea.vmem [#allocation9], %s961_s5 }
  0x9e   : > { %s1052_s12 = scalar_select %p1949_p3, [#allocation3], [#allocation14] }
  0x9f   : > { %s2341_s24 = scalar_select %p1955_p1, 1, 0 }
  0xa0   : > { %s102_s22 = ssub.s32 %s100_s18, %s101_s25  ;;  %s285_s26 = sshll.u32 %s276_s11, 4  ;;  %s1983_s26 = int_to_ptr.vmem [resolvable:$true] %s285_s26 }
  0xa1   : > { %p105_p10 = scmp.eq.s32.totalorder %s102_s22, 0  ;;  %p2342_p5 = scmp.lt.s32.totalorder %s1585_s20, 5 }
  0xa2   : > { %s1053_s3 = scalar_select %p1949_p3, %s1581_s19, 0 }
  0xa3   : > { %s1966_s16 = scalar_select %p105_p10, %s1561_s14, %s107_s28  }
  0xa4   : > { %s2398_s12 = smov (!%p2342_p5, %s1052_s12), [#allocation17]  ;;  %p2343_p8 = pmov %p2342_p5 }
  0xa5   : > { %p2344_p11 = pmov %p2342_p5  ;;  %s1981_s10 = sld [smem:[#allocation3 + %s1581_s19]] }
  0xa6   : > { %s2400_s3 = smov (!%p2343_p8, %s1053_s3), 0  ;;  %s1986_s27 = sld [smem:[#allocation3 + %s2392_s23]] }
  0xa7   : > { %p1976_p4 = pnand %p2344_p11, %p1949_p3  ;;  %s277_s30 = sld [smem:[%s2398_s12 + %s2400_s3]] }
  0xa8   : > { %p174_p12 = scmp.ne.s32.totalorder %s1537_s9, %s1533_s8  ;;  %s320_s25 = sand.u32 1, %s1537_s9  }
  0xa9   : > { %s2346_s5 = sld [smem:[#allocation42_spill]]  ;;  %p2347_p6 = pmov %p2338_p7 }
  0xaa   : > { %p1355_p7 = pneg %p1976_p4 }
  0xab   : > { %p2000_p9 = por %p174_p12, %p2347_p6 }
  0xad   : > { %s1004_s18 = sshll.u32 %s277_s30, 8 }
  0xaf   : > { %s1996_s22 = scalar_lea.hbm %s2346_s5, %s1004_s18  ;;  %s1358_s30 = scalar_lea.hbm %s2346_s5, 1024 }
  0xb0   : > { %s1353_s28 = scalar_lea.hbm %s1996_s22, 256  ;;  %p1359_p10 = scmp.lt.u32.totalorder %s1996_s22, %s2346_s5 }
  0xb1   : > { %p1354_p0 = scmp.ne.s32.totalorder %s1996_s22, %s1353_s28  ;;  %p1360_p5 = scmp.lt.u32.totalorder %s1358_s30, %s1353_s28 }
  0xb2   : > { %p1362_p11 = scmp.lt.u32.totalorder %s1353_s28, %s1996_s22 }
  0xb3   : > { %p1356_p3 = pnand %p1355_p7, %p1354_p0  ;;  %p1361_p8 = por %p1360_p5, %p1359_p10 }
  0xb5   : > { %p1357_p2 = pneg %p1356_p3  ;;  %p1363_p12 = por %p1362_p11, %p1361_p8 }
  0xb7   : > { %p1364_p6 = pnand %p1363_p12, %p1357_p2 }
  0xb9   : > { %1367 = shalt.err (!%p1364_p6)
}
  0xba   : > { %s1368_s6 = scalar_lea.vmem %s1983_s26, 256  ;;  %s1595_s11 = smov [#allocation9]  }
  0xbb   : > { %p1369_p0 = scmp.ne.s32.totalorder %s1983_s26, %s1368_s6  ;;  %s1373_s3 = sshll.u32 %s1595_s11, 4  ;;  %s1374_s3 = int_to_ptr.vmem [resolvable:$false] %s1373_s3 }
  0xbc   : > { %s1375_s18 = scalar_lea.vmem %s1374_s3, 512  ;;  %p1376_p1 = scmp.lt.s32.totalorder %s1983_s26, %s1374_s3 }
  0xbd   : > { %p1371_p3 = pnand %p1369_p0, %p1355_p7  ;;  %p1377_p10 = scmp.lt.s32.totalorder %s1375_s18, %s1368_s6 }
  0xbf   : > { %p1372_p13 = pneg %p1371_p3  ;;  %p1378_p5 = por %p1377_p10, %p1376_p1 }
  0xc1   : > { %p1379_p8 = pnand %p1378_p5, %p1372_p13 }
  0xc3   : > { %1382 = shalt.err (!%p1379_p8)
}
  0xc4   : > { %s2349_s28 = sld [smem:[#allocation37_spill]]  ;;  %p2350_p1 = scmp.eq.s32.totalorder %s1725_s21, 0 }
  0xc5   : > { %p2351_p13 = scmp.ne.s32.totalorder %s1533_s8, %s1529_s7  ;;  %s162_s30 = ssub.s32 %s1981_s10, %s1986_s27 }
  0xc6   : > { %s167_s15 = sadd.s32 1, %s1537_s9  ;;  %p165_p2 = scmp.eq.s32.totalorder %s162_s30, 0 }
  0xc7   : > { %p2038_p7 = por %p2351_p13, %p2350_p1  ;;  %s967_s6 = sshll.u32 %s320_s25, 5 }
  0xc8   : > { %s1058_s11 = scalar_select %p2000_p9, [#allocation3], [#allocation16] }
  0xc9   : > { %s2050_s3 = scalar_select %p165_p2, %s1537_s9, %s167_s15  }
  0xca   : > { %1079 = dma.hbm_to_vmem [thread:$0]  (!%p1976_p4), %s1996_s22, 256, %s1983_s26, %s2349_s28, %s1592_s29, %s1592_s29, %s1593_s17  }
  0xcb   : > { %s1059_s18 = scalar_select %p2000_p9, %s1581_s19, 0 }
  0xcc   : > { %p2353_p11 = scmp.lt.s32.totalorder %s1585_s20, 5  ;;  %s322_s10 = scalar_lea.vmem [#allocation12], %s967_s6 }
  0xcd   : > { %s332_s27 = sshll.u32 %s322_s10, 4  ;;  %s2357_s30 = sld [smem:[#allocation43_spill]]  ;;  %s2067_s27 = int_to_ptr.vmem [resolvable:$true] %s332_s27 }
  0xce   : > { %s2402_s11 = smov (!%p2353_p11, %s1058_s11), [#allocation19]  ;;  %p2354_p4 = pmov %p2353_p11 }
  0xd0   : > { %s2404_s18 = smov (!%p2354_p4, %s1059_s18), 0  ;;  %p2355_p12 = pmov %p2354_p4 }
  0xd1   : > { %s323_s26 = sld [smem:[%s2402_s11 + %s2404_s18]] }
  0xd2   : > { %p2063_p6 = pnand %p2355_p12, %p2000_p9 }
  0xd3   : > { %s1388_s18 = scalar_lea.hbm %s2357_s30, 2048 }
  0xd4   : > { %p1385_p0 = pneg %p2063_p6 }
  0xd7   : > { %s1006_s25 = sshll.u32 %s323_s26, 9 }
  0xd8   : > { %s2072_s15 = scalar_lea.hbm %s2357_s30, %s1006_s25 }
  0xd9   : > { %s1383_s12 = scalar_lea.hbm %s2072_s15, 512  ;;  %p1389_p5 = scmp.lt.u32.totalorder %s2072_s15, %s2357_s30 }
  0xda   : > { %p1384_p9 = scmp.ne.s32.totalorder %s2072_s15, %s1383_s12  ;;  %p1390_p8 = scmp.lt.u32.totalorder %s1388_s18, %s1383_s12 }
  0xdb   : > { %p1392_p13 = scmp.lt.u32.totalorder %s1383_s12, %s2072_s15 }
  0xdc   : > { %p1386_p3 = pnand %p1385_p0, %p1384_p9  ;;  %p1391_p1 = por %p1390_p8, %p1389_p5 }
  0xde   : > { %p1387_p10 = pneg %p1386_p3  ;;  %p1393_p2 = por %p1392_p13, %p1391_p1 }
  0xe0   : > { %p1394_p11 = pnand %p1393_p2, %p1387_p10 }
  0xe2   : > { %1397 = shalt.err (!%p1394_p11)
}
  0xe3   : > { %s1398_s25 = scalar_lea.vmem %s2067_s27, 512  ;;  %s1596_s22 = smov [#allocation12]  }
  0xe4   : > { %p1399_p4 = scmp.ne.s32.totalorder %s2067_s27, %s1398_s25  ;;  %s1403_s28 = sshll.u32 %s1596_s22, 4  ;;  %s1404_s28 = int_to_ptr.vmem [resolvable:$false] %s1403_s28 }
  0xe5   : > { %s1405_s6 = scalar_lea.vmem %s1404_s28, 1024  ;;  %p1406_p3 = scmp.lt.s32.totalorder %s2067_s27, %s1404_s28 }
  0xe6   : > { %p1401_p12 = pnand %p1399_p4, %p1385_p0  ;;  %p1407_p5 = scmp.lt.s32.totalorder %s1405_s6, %s1398_s25 }
  0xe8   : > { %p1402_p9 = pneg %p1401_p12  ;;  %p1408_p8 = por %p1407_p5, %p1406_p3 }
  0xea   : > { %p1409_p1 = pnand %p1408_p8, %p1402_p9 }
  0xec   : > { %1412 = shalt.err (!%p1409_p1)
}
  0xed   : > { %1089 = dma.hbm_to_vmem [thread:$0]  (!%p2063_p6), %s2072_s15, 512, %s2067_s27, %s1880_s0, %s1592_s29, %s1592_s29, %s1593_s17  }
  0xee   : > { %s2358_s12 = sld [smem:[#allocation38_spill]] }
  0xf4   : > { %p2359_p0 = scmp.ne.s32.totalorder %s2358_s12, 0 }
  0xf5   : > { %s2360_s11 = sld [smem:[#allocation30_spill]] (!%p2359_p0)  ;;  %s2361_s18 = sld [smem:[#allocation33_spill]] (!%p2359_p0) }
  0xf6   : > { %344 = sbr.rel (%p2359_p0) target bundleno = 768 (0x300), region = 40 }
  0xfb   : > { %s2106_s26 = sand.u32 (!%p2359_p0), 1, %s2360_s11   ;;  %p2362_p10 = scmp.ne.s32.totalorder (!%p2359_p0), %s2361_s18, 0 }
  0xfc   : > { %s971_s10 = sshll.u32 (!%p2359_p0), %s2106_s26, 4  ;;  %s347_s25 = scalar_lea.sflag (!%p2359_p0), [#allocation5], %s2106_s26 }
  0xfd   : > { %s2110_s22 = scalar_lea.vmem [#allocation4], %s971_s10 }
  0xfe   : > { %1504 = dma.done.wait (%p2362_p10), %s347_s25, 256  }
  0xff   : > { %1506 = vsyncadd (%p2362_p10), %s347_s25, 4294967040  ;;  %s355_s0 = sand.u32 1, %s1725_s21   ;;  %s972_s29 = sshll.u32 %s2106_s26, 5 }
 0x100   : > { %s356_s17 = scalar_lea.sflag [#allocation8], %s355_s0  ;;  %s2120_s7 = scalar_lea.vmem [#allocation7], %s972_s29 }
 0x101   : > { %1508 = dma.done.wait (%p2362_p10), %s356_s17, 512  }
 0x102   : > { %1510 = vsyncadd (%p2362_p10), %s356_s17, 4294966784  ;;  %s366_s27 = sand.u32 1, %s1557_s13   ;;  %p2363_p6 = scmp.ne.s32.totalorder %s2341_s24, 0 }
 0x103   : > { %s973_s15 = sshll.u32 %s366_s27, 4 }
 0x104   : > { %s368_s28 = scalar_lea.vmem [#allocation9], %s973_s15 }
 0x105   : > { %1512 = dma.done.wait (%p2363_p6), %s356_s17, 256  }
 0x106   : > { %1514 = vsyncadd (%p2363_p6), %s356_s17, 4294967040  ;;  %s2364_s21 = sld [smem:[#allocation27_spill]]  ;;  %s2365_s6 = sld [smem:[#allocation39_spill]] }
 0x107   : > { %s374_s10 = scalar_lea.sflag [#allocation11], %s355_s0 }
 0x10c   : > { %s375_s12 = sand.u32 1, %s2364_s21   ;;  %p2366_p13 = scmp.ne.s32.totalorder %s2365_s6, 0 }
 0x10d   : > { %s974_s11 = sshll.u32 %s375_s12, 4 }
 0x10e   : > { %s377_s25 = scalar_lea.vmem [#allocation10], %s974_s11 }
 0x10f   : > { %1516 = dma.done.wait (%p2366_p13), %s374_s10, 256  }
 0x110   : > { %1518 = vsyncadd (%p2366_p13), %s374_s10, 4294967040  ;;  %s384_s18 = sand.u32 1, %s1533_s8  }
 0x111   : > { %s975_s27 = sshll.u32 %s384_s18, 5 }
 0x112   : > { %s2137_s15 = scalar_lea.vmem [#allocation12], %s975_s27 }
 0x113   : > { %1520 = dma.done.wait (%p2038_p7), %s374_s10, 512  }
 0x114   : > { %1522 = vsyncadd (%p2038_p7), %s374_s10, 4294966784  ;;  %v1597_v0 = vmov 0   ;;  %v1227_v1 = vld [vmem:[%s368_s28] sm:$0xff]   ;;  %v1228_v2 = vld [vmem:[%s368_s28 + $0x8] sm:$0xff]   ;;  %vm445_vm0 = vcmask 261120   ;;  %s2159_s24 = scalar_lea.vmem [#allocation13], %s972_s29 }
 0x115   : > { %1225 = vset.pattern.permute.xlu0 %v1597_v0  ;;  %1226 = vset.pattern.permute.xlu1 %v1597_v0  ;;  %v1229_v3 = vld [vmem:[%s2110_s22] sm:$0xff]   ;;  %v1230_v5 = vld [vmem:[%s2110_s22 + $0x8] sm:$0xff]   ;;  %v1598_v15 = vmov 0.0   ;;  %s2367_s2 = sld [smem:[#allocation32_spill]]  ;;  %vm699_vm1 = vcmask 523264   ;;  %s777_s0 = sshll.u32 %s2159_s24, 4  ;;  %s2182_s0 = int_to_ptr.vmem [resolvable:$true] %s777_s0 }
 0x116   : > { %1022 = vmatprep.subr.bf16.mxu1 %v1227_v1  ;;  %1026 = vmatprep.mubr.msk.bf16.mxu1 %vm445_vm0, %v1229_v3  ;;  %v1231_v4 = vld [vmem:[%s377_s25] sm:$0xff]   ;;  %v1232_v6 = vld [vmem:[%s377_s25 + $0x8] sm:$0xff]   ;;  %448 = vst.msk [vmem:[%s2159_s24 + $0x10] sm:$0xff] %vm445_vm0, %v1598_v15  ;;  %446 = vst.msk [vmem:[%s2159_s24] sm:$0xff] %vm445_vm0, %v1598_v15  ;;  %s2368_s29 = sld [smem:[#allocation34_spill]]  ;;  %s2369_s28 = sld [smem:[#allocation44_spill]] }
 0x117   : > { %1023 = vmatpush3.bf16.msra.mxu1 %v1227_v1  ;;  %v633_v7 = vld [vmem:[%s2120_s7] sm:$0xff]  ;;  %v635_v8 = vld [vmem:[%s2120_s7 + $0x10] sm:$0xff]  ;;  %v634_v9 = vld [vmem:[%s2120_s7 + $0x8] sm:$0xff]  ;;  %447 = vst.msk [vmem:[%s2159_s24 + $0x8] sm:$0xff] %vm445_vm0, %v1598_v15  ;;  %s764_s6 = scalar_lea.sflag [#allocation6], %s2106_s26  ;;  %s1413_s12 = scalar_lea.vmem %s2182_s0, 512 }
 0x118   : > { %1024 = vmatprep.subr.bf16.mxu1 %v1228_v2  ;;  %639 = vperm.xlu0 %1225, %v633_v7   ;;  %v636_v10 = vld [vmem:[%s2120_s7 + $0x18] sm:$0xff]  ;;  %v1233_v11 = vld [vmem:[%s2137_s15] sm:$0xff]   ;;  %v1234_v12 = vld [vmem:[%s2137_s15 + $0x8] sm:$0xff]   ;;  %449 = vst.msk [vmem:[%s2159_s24 + $0x18] sm:$0xff] %vm445_vm0, %v1598_v15  ;;  %p1414_p7 = scmp.ne.s32.totalorder %s2182_s0, %s1413_s12  ;;  %s1599_s11 = smov [#allocation13]  }
 0x119   : > { %649 = vperm.xlu1 %1226, %v635_v8   ;;  %1038 = vmatprep.subr.bf16.mxu0 %v1233_v11  ;;  %v1235_v13 = vld [vmem:[%s2137_s15 + $0x10] sm:$0xff]   ;;  %v1236_v14 = vld [vmem:[%s2137_s15 + $0x18] sm:$0xff]   ;;  %s1417_s10 = sshll.u32 %s1599_s11, 4  ;;  %s1418_s10 = int_to_ptr.vmem [resolvable:$false] %s1417_s10 }
 0x11a   : > { %1039 = vmatpush3.bf16.msra.mxu0 %v1233_v11  ;;  %s1419_s25 = scalar_lea.vmem %s1418_s10, 1024  ;;  %p1420_p12 = scmp.lt.s32.totalorder %s2182_s0, %s1418_s10 }
 0x11b   : > { %1025 = vmatpush3.bf16.msra.mxu1 %v1228_v2  ;;  %1040 = vmatprep.subr.bf16.mxu0 %v1234_v12  ;;  %s1007_s22 = sshll.u32 %s2367_s2, 9  ;;  %p1421_p9 = scmp.lt.s32.totalorder %s1419_s25, %s1413_s12 }
 0x11c   : > { %1030 = vmatprep.subr.bf16.mxu1 %v1231_v4  ;;  %644 = vperm.xlu0 %1225, %v634_v9   ;;  %s2180_s21 = scalar_lea.hbm %s2369_s28, %s1007_s22  ;;  %p2370_p2 = scmp.ne.s32.totalorder %s2368_s29, 0 }
 0x11d   : > { %654 = vperm.xlu1 %1226, %v636_v10   ;;  %v663_v58 = vld [vmem:[%s2159_s24 + $0x10] sm:$0xff]  ;;  %v661_v59 = vld [vmem:[%s2159_s24] sm:$0xff]  ;;  %p1422_p3 = por %p1421_p9, %p1420_p12 }
 0x11e   : > { %1027 = vmatmul.mubr.msk.bf16.vlgmr.msra.gmra.mrb[0].mxu1 %vm445_vm0, %v1230_v5  ;;  %1041 = vmatpush3.bf16.msra.mxu0 %v1234_v12  ;;  %v662_v0 = vld [vmem:[%s2159_s24 + $0x8] sm:$0xff]  ;;  %p1415_p11 = pnand %p1414_p7, %p2370_p2 }
 0x11f   : > { %1031 = vmatpush3.bf16.msra.mxu1 %v1231_v4  ;;  %1034 = vmatprep.mubr.msk.bf16.mxu1 %vm445_vm0, %v1229_v3  ;;  %v664_v61 = vld [vmem:[%s2159_s24 + $0x18] sm:$0xff] }
 0x120   : > { %1032 = vmatprep.subr.bf16.mxu1 %v1232_v6  ;;  %1042 = vmatprep.subr.bf16.mxu0 %v1235_v13  ;;  %p1416_p4 = pneg %p1415_p11 }
 0x122   : > { %1043 = vmatpush3.bf16.msra.mxu0 %v1235_v13  ;;  %p1423_p5 = pnand %p1422_p3, %p1416_p4 }
 0x123   : > { %1033 = vmatpush3.bf16.msra.mxu1 %v1232_v6  ;;  %1044 = vmatprep.subr.bf16.mxu0 %v1236_v14 }
 0x126   : > { %1035 = vmatmul.mubr.msk.bf16.vlgmr.msra.gmra.mrb[4].mxu1 %vm445_vm0, %v1230_v5  ;;  %1045 = vmatpush3.bf16.msra.mxu0 %v1236_v14 }
 0x197   : > { %v640_v40 = vpop.permute.xlu0 %639 }
 0x198   : > { %v650_v37 = vpop.permute.xlu1 %649 }
 0x19b   : > { %v645_v52 = vpop.permute.xlu0 %644 }
 0x19c   : > { %v655_v50 = vpop.permute.xlu1 %654 }
 0x1f1   : > { %v1028_v16 = vpop.f32.mrb[0].mxu1 }
 0x1f2   : > { %v989_v17 = vmul.f32 -1.442695, %v1028_v16  ;;  %v521_v18 = vpop.f32.mrb[1].mxu1 }
 0x1f3   : > { %v987_v19 = vmul.f32 -1.442695, %v521_v18  ;;  %v1029_v20 = vpop.f32.mrb[2].mxu1 }
 0x1f4   : > { %1237 = vpow2.f32 %v989_v17  ;;  %v990_v21 = vmul.f32 -1.442695, %v1029_v20  ;;  %v524_v22 = vpop.f32.mrb[3].mxu1 }
 0x1f5   : > { %1239 = vpow2.f32 %v987_v19  ;;  %v988_v23 = vmul.f32 -1.442695, %v524_v22 }
 0x1f6   : > { %1241 = vpow2.f32 %v990_v21 }
 0x1f7   : > { %1243 = vpow2.f32 %v988_v23 }
 0x1f9   : > { %v1036_v24 = vpop.f32.mrb[4].mxu1 }
 0x1fa   : > { %v586_v25 = vpop.f32.mrb[5].mxu1 }
 0x1fb   : > { %v1037_v26 = vpop.f32.mrb[6].mxu1 }
 0x1fc   : > { %v589_v27 = vpop.f32.mrb[7].mxu1 }
 0x1fe   : > { %v1238_v28 = vpop.eup %1237 }
 0x1ff   : > { %v1240_v29 = vpop.eup %1239  ;;  %v615_v30 = vadd.f32 1.0, %v1238_v28 }
 0x200   : > { %v1242_v31 = vpop.eup %1241  ;;  %v613_v32 = vadd.f32 1.0, %v1240_v29 }
 0x201   : > { %v1244_v33 = vpop.eup %1243  ;;  %1245 = vrcp.f32 %v615_v30  ;;  %v616_v34 = vadd.f32 1.0, %v1242_v31 }
 0x202   : > { %1247 = vrcp.f32 %v613_v32  ;;  %v614_v35 = vadd.f32 1.0, %v1244_v33 }
 0x203   : > { %1249 = vrcp.f32 %v616_v34 }
 0x204   : > { %1251 = vrcp.f32 %v614_v35 }
 0x20b   : > { %v1246_v36 = vpop.eup %1245 }
 0x20c   : > { %v1248_v38 = vpop.eup %1247  ;;  %v627_v39 = vmul.f32 %v1246_v36, %v1028_v16 }
 0x20d   : > { %v1250_v41 = vpop.eup %1249  ;;  %v625_v42 = vmul.f32 %v1248_v38, %v521_v18 }
 0x20e   : > { %v1252_v43 = vpop.eup %1251  ;;  %v628_v44 = vmul.f32 %v1250_v41, %v1029_v20  ;;  %v631_v45 = vmul.f32 %v1036_v24, %v627_v39 }
 0x20f   : > { %v626_v46 = vmul.f32 %v1252_v43, %v524_v22  ;;  %v629_v47 = vmul.f32 %v625_v42, %v586_v25 }
 0x210   : > { %v632_v48 = vmul.f32 %v1037_v26, %v628_v44  ;;  %v659_v51 = vmul.f32 %v650_v37, %v631_v45 }
 0x211   : > { %v630_v49 = vmul.f32 %v626_v46, %v589_v27  ;;  %v657_v54 = vmul.f32 %v640_v40, %v629_v47 }
 0x212   : > { %v660_v53 = vmul.f32 %v655_v50, %v632_v48 }
 0x213   : > { %v658_v55 = vmul.f32 %v645_v52, %v630_v49 }
 0x214   : > { %v666_v56 = vpack.c.bf16 %v660_v53, %v659_v51 }
 0x215   : > { %v665_v57 = vpack.c.bf16 %v658_v55, %v657_v54 }
 0x217   : > { %1046 = vmatprep.mubr.msk.bf16.mxu0 %vm699_vm1, %v665_v57 }
 0x218   : > { %1047 = vmatmul.mubr.msk.bf16.vlgmr.msra.gmra.mrb[0].mxu0 %vm699_vm1, %v666_v56 }
 0x2eb   : > { %v1048_v60 = vpop.f32.mrb[0].mxu0 }
 0x2ec   : > { %v757_v62 = vadd.f32 %v1048_v60, %v663_v58  ;;  %v740_v63 = vpop.f32.mrb[1].mxu0 }
 0x2ed   : > { %v755_v1 = vadd.f32 %v740_v63, %v661_v59  ;;  %v1049_v2 = vpop.f32.mrb[2].mxu0 }
 0x2ee   : > { %761 = vst.msk [vmem:[%s2159_s24 + $0x10] sm:$0xff] %vm445_vm0, %v757_v62  ;;  %v758_v3 = vadd.f32 %v1049_v2, %v664_v61  ;;  %v743_v4 = vpop.f32.mrb[3].mxu0 }
 0x2ef   : > { %759 = vst.msk [vmem:[%s2159_s24] sm:$0xff] %vm445_vm0, %v755_v1  ;;  %v756_v5 = vadd.f32 %v743_v4, %v662_v0 }
 0x2f0   : > { %762 = vst.msk [vmem:[%s2159_s24 + $0x18] sm:$0xff] %vm445_vm0, %v758_v3 }
 0x2f1   : > { %760 = vst.msk [vmem:[%s2159_s24 + $0x8] sm:$0xff] %vm445_vm0, %v756_v5 }
 0x2f2   : > { %1426 = shalt.err (!%p1423_p5)
}
 0x2f3   : > { %s1427_s18 = scalar_lea.hbm %s2180_s21, 512  ;;  %s1431_s24 = scalar_lea.hbm %s2369_s28, 2560 }
 0x2f4   : > { %p1428_p8 = scmp.ne.s32.totalorder %s2180_s21, %s1427_s18  ;;  %p1432_p10 = scmp.lt.u32.totalorder %s2180_s21, %s2369_s28 }
 0x2f5   : > { %p1433_p6 = scmp.lt.u32.totalorder %s1431_s24, %s1427_s18  ;;  %p1435_p7 = scmp.lt.u32.totalorder %s1427_s18, %s2180_s21 }
 0x2f6   : > { %p1429_p1 = pnand %p1428_p8, %p2370_p2 }
 0x2f7   : > { %p1434_p13 = por %p1433_p6, %p1432_p10 }
 0x2f8   : > { %p1430_p0 = pneg %p1429_p1 }
 0x2f9   : > { %p1436_p11 = por %p1435_p7, %p1434_p13 }
 0x2fb   : > { %p1437_p4 = pnand %p1436_p11, %p1430_p0 }
 0x2fd   : > { %1440 = shalt.err (!%p1437_p4)
}
 0x2fe   : > { %s1600_s17 = smov 128   ;;  %s1601_s7 = smov 8  }
 0x2ff   : > { %1066 = dma.vmem_to_hbm [thread:$0]  (%p2370_p2), %s2182_s0, 512, %s2180_s21, %s764_s6, %s1600_s17, %s1600_s17, %s1601_s7  }
 0x300 PF: > { %s2371_s12 = sld [smem:[#allocation29_spill]]  ;;  %s2372_s11 = sld [smem:[#allocation36_spill]] }
 0x301   : > { %p1095_p12 = scmp.ge.s32.totalorder %s1585_s20, 2 }
 0x306   : > { %s792_s10 = sand.u32 1, %s2371_s12   ;;  %p2373_p9 = scmp.ne.s32.totalorder %s2372_s11, 0 }
 0x307   : > { %s793_s25 = scalar_lea.sflag [#allocation6], %s792_s10 }
 0x308   : > { %p1091_p3 = pnand %p1095_p12, %p2373_p9 }
 0x30a   : > { %1524 = dma.done.wait (!%p1091_p3), %s793_s25, 512  }
 0x30b   : > { %1526 = vsyncadd (!%p1091_p3), %s793_s25, 4294966784  ;;  %s32_s20 = sadd.s32 1, %s1585_s20   ;;  %s2375_s10 = sld [smem:[#allocation27_spill]] }
 0x30c   : > { %p2219_p5 = scmp.ge.s32.totalorder %s32_s20, 7   ;;  %s2376_s0 = sld [smem:[#allocation28_spill]] }
 0x30d   : > { %s2377_s11 = sld [smem:[#allocation40_spill]]  ;;  %s2378_s15 = sld [smem:[#allocation30_spill]] }
 0x30e   : > { %s2379_s26 = sld [smem:[#allocation31_spill]]  ;;  %s2380_s17 = sld [smem:[#allocation35_spill]] }
 0x30f   : > { %s2382_s7 = smov %s1533_s8  ;;  %s2383_s8 = smov %s1537_s9 }
 0x310   : > { %s2384_s9 = smov %s2050_s3  ;;  %s2385_s12 = smov %s1557_s13 }
 0x311   : > { %s2386_s13 = smov %s1561_s14  ;;  %s2387_s14 = smov %s1966_s16 }
 0x312   : > { %s2389_s18 = smov %s1581_s19  ;;  %s2390_s19 = smov %s2392_s23 }
 0x313   :  { %31 = sbr.rel (!%p2219_p5) target bundleno = 28 (0x1c), region = 137 }
 0x314   : > { %s2388_s16 = smov %s2379_s26 }
 0x31a   :  { %798 = vsyncpa [#allocation5], 1 }
 0x31b   :  { %800 = vsyncpa [#allocation5 + $0x1], 1 }
 0x31c   :  { %801 = vsyncpa [#allocation8], 1 }
 0x31d   :  { %803 = vsyncpa [#allocation8 + $0x1], 1 }
 0x31e   :  { %804 = vsyncpa [#allocation11], 1 }
 0x31f   :  { %806 = vsyncpa [#allocation11 + $0x1], 1 }
 0x320   :  { %807 = vsyncpa [#allocation6], 1 }
 0x321   :  { %809 = vsyncpa [#allocation6 + $0x1], 1 }

</bundles_post_ra>
